<compile_context>
chip_gen: v7x
topology: tpu7x:2x2x1
jax: 0.10.0
libtpu: 0.0.40
codegen_flags: <defaults>
</compile_context>

<pallas_src>
import jax
import jax.numpy as jnp
from jax import lax
from jax.experimental import pallas as pl
from jax.experimental.pallas import tpu as pltpu

_BN_EPS = 1e-5
_VMEM_LIMIT = 48 * 1024 * 1024       # safe ceiling on v5e/v6e (128 MiB) and v7x (64 MiB)
_STREAM_BUDGET = 20 * 1024 * 1024    # budget for the double-buffered streaming tiles


def _round_up(v, m):
    return ((v + m - 1) // m) * m


# ------------------------------------------------------------------ kernels --

def _linear_relu_stats_kernel(nvalid_ref, x_ref, w_ref, b_ref,
                              h_ref, sum_ref, sq_ref):
    """h = relu(x @ W + b); write the bf16 activation-cache tile and accumulate
    the per-core masked batch sum / sum-of-squares (BatchNorm statistics)."""
    tiles_per_core = pl.num_programs(1)
    g = pl.program_id(0) * tiles_per_core + pl.program_id(1)   # global batch tile
    tm = x_ref.shape[0]

    @pl.when(pl.program_id(1) == 0)
    def _init():
        sum_ref[...] = jnp.zeros_like(sum_ref)
        sq_ref[...] = jnp.zeros_like(sq_ref)

    h = jnp.dot(x_ref[...].astype(jnp.bfloat16), w_ref[...],
                preferred_element_type=jnp.float32)
    h = jnp.maximum(h + b_ref[...], 0.0)
    h_ref[...] = h.astype(jnp.bfloat16)

    # Rows >= n_valid (ragged last tile / phantom tiles) are excluded from the
    # statistics via a select, which stays correct even if those rows contain
    # uninitialised-VMEM garbage (a 0 * NaN multiply-mask would not).
    row = lax.broadcasted_iota(jnp.int32, (tm, 1), 0) + g * tm
    hm = jnp.where(row < nvalid_ref[0], h, 0.0)
    ones = jnp.ones((1, tm), jnp.float32)
    s = jnp.dot(ones, hm, preferred_element_type=jnp.float32)          # (1, H)
    q = jnp.dot(ones, hm * hm, preferred_element_type=jnp.float32)     # (1, H)
    sum_ref[...] += s[None]
    sq_ref[...] += q[None]


def _linear_relu_kernel(x_ref, w_ref, b_ref, o_ref):
    o = jnp.dot(x_ref[...], w_ref[...], preferred_element_type=jnp.float32)
    o_ref[...] = jnp.maximum(o + b_ref[...], 0.0).astype(o_ref.dtype)


# ------------------------------------------------------------- host wrappers --

def _linear_relu_with_stats(inp, w_bf16, b_f32, nvalid, *, tm, nc, npc):
    """One streamed Linear+ReLU stage.  Returns (bf16 activation cache padded to
    nc*npc*tm rows, batch sum (1,H) f32, batch sum-of-squares (1,H) f32)."""
    n_in, k = inp.shape
    h = w_bf16.shape[1]
    nt_pad = nc * npc
    rows_pad = nt_pad * tm
    nt_in = pl.cdiv(n_in, tm)          # valid input blocks (phantom tiles clamp here)

    def in_idx(c, i, nv):              # never read a fully out-of-range block
        return (jnp.minimum(c * npc + i, nt_in - 1), 0)

    def cache_idx(c, i, nv):
        return (c * npc + i, 0)

    def stats_idx(c, i, nv):           # one resident accumulator row per core
        return (c, 0, 0)

    def const_idx(c, i, nv):           # weights / bias stay VMEM-resident
        return (0, 0)

    grid_spec = pltpu.PrefetchScalarGridSpec(
        num_scalar_prefetch=1,
        grid=(nc, npc),
        in_specs=[
            pl.BlockSpec((tm, k), in_idx),        # streamed activations
            pl.BlockSpec((k, h), const_idx),      # weights
            pl.BlockSpec((1, h), const_idx),      # bias
        ],
        out_specs=[
            pl.BlockSpec((tm, h), cache_idx),     # bf16 activation cache
            pl.BlockSpec((1, 1, h), stats_idx),   # per-core partial sum
            pl.BlockSpec((1, 1, h), stats_idx),   # per-core partial sum of squares
        ],
    )

    cache, psum, psq = pl.pallas_call(
        _linear_relu_stats_kernel,
        grid_spec=grid_spec,
        out_shape=[
            jax.ShapeDtypeStruct((rows_pad, h), jnp.bfloat16),
            jax.ShapeDtypeStruct((nc, 1, h), jnp.float32),
            jax.ShapeDtypeStruct((nc, 1, h), jnp.float32),
        ],
        compiler_params=pltpu.CompilerParams(
            dimension_semantics=("parallel", "arbitrary"),
            vmem_limit_bytes=_VMEM_LIMIT),
    )(nvalid, inp, w_bf16, b_f32)

    # Combine the per-core partial statistics (tiny, plain JAX).
    return cache, psum.sum(axis=0), psq.sum(axis=0)


def _bn_fold(bsum, bsq, n, gamma, beta, w_next, b_next):
    """Finalize training-mode BatchNorm (biased variance) and fold its affine
    into the next Linear layer:  BN(h) @ W + b  ==  h @ W' + b'."""
    inv_n = 1.0 / float(n)
    mu = bsum * inv_n
    var = jnp.maximum(bsq * inv_n - mu * mu, 0.0)
    scale = gamma * lax.rsqrt(var + _BN_EPS)          # (1, H)
    shift = beta - mu * scale                         # (1, H)
    w_f = (w_next * scale.T).astype(jnp.bfloat16)     # (H, H_next)
    b_f = (b_next + shift @ w_next).astype(jnp.float32)
    return w_f, b_f


def _linear_relu_out(h2, w_bf16, b_f32, *, n, tm):
    """Final Linear+ReLU, writing an unpadded (n, C) f32 output."""
    k = h2.shape[1]
    cdim = w_bf16.shape[1]
    nt = pl.cdiv(n, tm)
    grid_spec = pltpu.PrefetchScalarGridSpec(
        num_scalar_prefetch=0,
        grid=(nt,),
        in_specs=[
            pl.BlockSpec((tm, k), lambda i: (i, 0)),
            pl.BlockSpec((k, cdim), lambda i: (0, 0)),
            pl.BlockSpec((1, cdim), lambda i: (0, 0)),
        ],
        out_specs=pl.BlockSpec((tm, cdim), lambda i: (i, 0)),
    )
    return pl.pallas_call(
        _linear_relu_kernel,
        grid_spec=grid_spec,
        out_shape=jax.ShapeDtypeStruct((n, cdim), jnp.float32),
        compiler_params=pltpu.CompilerParams(
            dimension_semantics=("parallel",),
            vmem_limit_bytes=_VMEM_LIMIT),
    )(h2, w_bf16, b_f32)


def classifier_forward(x, params, *, tm=1024):
    """x: (N, in_features) float32.  Returns (N, num_classes) float32."""
    n, f = x.shape
    h1d = params["w1"].shape[1]          # 128

    # Tile size: multiple of 8, no larger than the (rounded-up) batch, and
    # small enough that the double-buffered x tile + h1-cache tile stay well
    # inside VMEM even on v7x (64 MiB physical).
    tm_cap = max(8, _STREAM_BUDGET // (8 * f + 4 * h1d + 8))
    tm = max(8, (min(tm, tm_cap, _round_up(n, 8)) // 8) * 8)

    nt = pl.cdiv(n, tm)                  # batch tiles
    nc = 2 if nt >= 2 else 1             # megacore split (v7x); harmless on 1-TC chips
    npc = pl.cdiv(nt, nc)                # tiles per core

    nvalid = jnp.array([n], jnp.int32)   # scalar-prefetch: no recompile per batch size

    # ---- stage 1: Linear(F, 128) + ReLU, BN1 statistics ----
    w1 = params["w1"].astype(jnp.bfloat16)
    b1 = params["b1"].astype(jnp.float32)
    h1, s1, q1 = _linear_relu_with_stats(x, w1, b1, nvalid, tm=tm, nc=nc, npc=npc)

    # ---- fold BN1 affine into Linear(128, 32) (tiny, plain JAX) ----
    w2f, b2f = _bn_fold(s1, q1, n, params["g1"], params["be1"],
                        params["w2"], params["b2"])

    # ---- stage 2: Linear(128, 32) + ReLU, BN2 statistics ----
    h2, s2, q2 = _linear_relu_with_stats(h1, w2f, b2f, nvalid, tm=tm, nc=nc, npc=npc)

    # ---- fold BN2 affine into Linear(32, C) ----
    w3f, b3f = _bn_fold(s2, q2, n, params["g2"], params["be2"],
                        params["w3"], params["b3"])

    # ---- stage 3: Linear(32, C) + ReLU -> unpadded (N, C) f32 output ----
    return _linear_relu_out(h2, w3f, b3f, n=n, tm=tm)


# ----------------------------------------------------------- params / checks --

def init_params(key, in_features, num_classes, gain=0.02):
    """Synthetic init mirroring init_weights('normal', 0.02):
    Linear weights ~ N(0, gain), biases = 0.  BatchNorm gamma=1, beta=0."""
    k1, k2, k3 = jax.random.split(key, 3)
    return {
        "w1": gain * jax.random.normal(k1, (in_features, 128), jnp.float32),
        "b1": jnp.zeros((1, 128), jnp.float32),
        "g1": jnp.ones((1, 128), jnp.float32),
        "be1": jnp.zeros((1, 128), jnp.float32),
        "w2": gain * jax.random.normal(k2, (128, 32), jnp.float32),
        "b2": jnp.zeros((1, 32), jnp.float32),
        "g2": jnp.ones((1, 32), jnp.float32),
        "be2": jnp.zeros((1, 32), jnp.float32),
        "w3": gain * jax.random.normal(k3, (32, num_classes), jnp.float32),
        "b3": jnp.zeros((1, num_classes), jnp.float32),
    }


def _reference_forward_f32(x, p):
    """Pure-f32 reference with exact PyTorch (training-mode BN) semantics."""
    h = jnp.maximum(x @ p["w1"] + p["b1"], 0.0)
    mu = jnp.mean(h, axis=0, keepdims=True)
    var = jnp.mean(jnp.square(h - mu), axis=0, keepdims=True)
    h = (h - mu) / jnp.sqrt(var + _BN_EPS) * p["g1"] + p["be1"]
    h = jnp.maximum(h @ p["w2"] + p["b2"], 0.0)
    mu2 = jnp.mean(h, axis=0, keepdims=True)
    var2 = jnp.mean(jnp.square(h - mu2), axis=0, keepdims=True)
    h = (h - mu2) / jnp.sqrt(var2 + _BN_EPS) * p["g2"] + p["be2"]
    return jnp.maximum(h @ p["w3"] + p["b3"], 0.0)


def _reference_forward_matched(x, p):
    """Same precision mix as the kernel: bf16 matmul operands / f32 accumulation,
    bf16 activation caches, one-pass biased variance, BN folded into the next
    Linear layer's weights."""
    bf, f32 = jnp.bfloat16, jnp.float32

    def bn_affine(h, g, be):
        mu = jnp.mean(h, axis=0, keepdims=True)
        var = jnp.maximum(jnp.mean(h * h, axis=0, keepdims=True) - mu * mu, 0.0)
        scale = g * lax.rsqrt(var + _BN_EPS)
        return scale, be - mu * scale

    h1 = jnp.maximum(jnp.dot(x.astype(bf), p["w1"].astype(bf),
                             preferred_element_type=f32) + p["b1"], 0.0)
    s1, t1 = bn_affine(h1, p["g1"], p["be1"])
    w2f = (p["w2"] * s1.T).astype(bf)
    b2f = p["b2"] + t1 @ p["w2"]
    h2 = jnp.maximum(jnp.dot(h1.astype(bf), w2f,
                             preferred_element_type=f32) + b2f, 0.0)
    s2, t2 = bn_affine(h2, p["g2"], p["be2"])
    w3f = (p["w3"] * s2.T).astype(bf)
    b3f = p["b3"] + t2 @ p["w3"]
    return jnp.maximum(jnp.dot(h2.astype(bf), w3f,
                               preferred_element_type=f32) + b3f, 0.0)


if __name__ == "__main__":
    in_features = 64
    num_classes = 10
    batch = 200          # deliberately NOT a multiple of the batch tile

    key = jax.random.PRNGKey(0)
    kx, kp = jax.random.split(key)
    x = jax.random.normal(kx, (batch, in_features), jnp.float32)
    params = init_params(kp, in_features, num_classes)

    # tm=96 -> 3 ragged batch tiles, a 2-way core split with one phantom tile:
    # exercises every masking / padding path.
    out = classifier_forward(x, params, tm=96)
    out = jax.block_until_ready(out)
    assert out.shape == (batch, num_classes)
    assert bool(jnp.all(jnp.isfinite(out)))

    ref_matched = _reference_forward_matched(x, params)
    ref_f32 = _reference_forward_f32(x, params)
    err_m = float(jnp.max(jnp.abs(out - ref_matched)))
    err_f = float(jnp.max(jnp.abs(out - ref_f32)))
    assert jnp.allclose(out, ref_matched, atol=5e-3, rtol=5e-3), f"matched-ref err={err_m}"
    assert jnp.allclose(out, ref_f32, atol=5e-2, rtol=5e-2), f"f32-ref err={err_f}"

    print("KERNEL_OK")
</pallas_src>

<mosaic_0001>
module attributes {stable_mosaic.version = 11 : i64} {
  func.func @_linear_relu_stats_kernel(%arg0: i32, %arg1: i32, %arg2: memref<1xi32, #tpu.memory_space<smem>>, %arg3: memref<96x64xf32, #tpu.memory_space<vmem>>, %arg4: memref<64x128xbf16, #tpu.memory_space<vmem>>, %arg5: memref<1x128xf32, #tpu.memory_space<vmem>>, %arg6: memref<96x128xbf16, #tpu.memory_space<vmem>>, %arg7: memref<1x1x128xf32, #tpu.memory_space<vmem>>, %arg8: memref<1x1x128xf32, #tpu.memory_space<vmem>>) attributes {dimension_semantics = [#tpu.dimension_semantics<parallel>, #tpu.dimension_semantics<arbitrary>], iteration_bounds = array<i64: 2, 2>, scalar_prefetch = 1 : i64, scratch_operands = 0 : i64, tpu.core_type = #tpu.core_type<tc>, window_params = [{transform_indices = @transform_0, window_bounds = array<i64: 96, 64>}, {pipeline_mode = #tpu.pipeline_mode<synchronous>, transform_indices = @transform_1, window_bounds = array<i64: 64, 128>}, {pipeline_mode = #tpu.pipeline_mode<synchronous>, transform_indices = @transform_2, window_bounds = array<i64: 1, 128>}, {transform_indices = @transform_3, window_bounds = array<i64: 96, 128>}, {transform_indices = @transform_4, window_bounds = array<i64: 1, 1, 128>}, {transform_indices = @transform_5, window_bounds = array<i64: 1, 1, 128>}]} {
    %c2_i32 = arith.constant 2 : i32
    %0 = arith.muli %arg0, %c2_i32 : i32
    %1 = arith.addi %0, %arg1 : i32
    %c0_i32 = arith.constant 0 : i32
    %2 = arith.cmpi eq, %arg1, %c0_i32 : i32
    %3 = arith.extui %2 : i1 to i32
    %c0_i32_0 = arith.constant 0 : i32
    %4 = arith.cmpi ne, %3, %c0_i32_0 : i32
    scf.if %4 {
      %cst_26 = arith.constant 0.000000e+00 : f32
      %39 = vector.broadcast %cst_26 : f32 to vector<1x1x128xf32>
      %c0_27 = arith.constant 0 : index
      %c0_28 = arith.constant 0 : index
      %c0_29 = arith.constant 0 : index
      %40 = vector.load %arg7[%c0_27, %c0_28, %c0_29] : memref<1x1x128xf32, #tpu.memory_space<vmem>>, vector<1x1x128xf32>
      tpu.vector_store %arg7[%c0_27, %c0_28, %c0_29], %39 {strides = array<i32>} : memref<1x1x128xf32, #tpu.memory_space<vmem>>, vector<1x1x128xf32>,
      %cst_30 = arith.constant 0.000000e+00 : f32
      %41 = vector.broadcast %cst_30 : f32 to vector<1x1x128xf32>
      %c0_31 = arith.constant 0 : index
      %c0_32 = arith.constant 0 : index
      %c0_33 = arith.constant 0 : index
      %42 = vector.load %arg8[%c0_31, %c0_32, %c0_33] : memref<1x1x128xf32, #tpu.memory_space<vmem>>, vector<1x1x128xf32>
      tpu.vector_store %arg8[%c0_31, %c0_32, %c0_33], %41 {strides = array<i32>} : memref<1x1x128xf32, #tpu.memory_space<vmem>>, vector<1x1x128xf32>,
    } else {
    }
    %c0 = arith.constant 0 : index
    %c0_1 = arith.constant 0 : index
    %5 = vector.load %arg3[%c0, %c0_1] : memref<96x64xf32, #tpu.memory_space<vmem>>, vector<96x64xf32>
    %6 = arith.truncf %5 : vector<96x64xf32> to vector<96x64xbf16>
    %c0_2 = arith.constant 0 : index
    %c0_3 = arith.constant 0 : index
    %7 = vector.load %arg4[%c0_2, %c0_3] : memref<64x128xbf16, #tpu.memory_space<vmem>>, vector<64x128xbf16>
    %cst = arith.constant dense<0.000000e+00> : vector<96x128xf32>
    %8 = tpu.matmul %6, %7, %cst {dimension_numbers = #tpu.dot_dimension_numbers<[1], [0], [0], [1], [0, 0, 1, 1], [], []>} : vector<96x64xbf16>, vector<64x128xbf16>, vector<96x128xf32> -> vector<96x128xf32>
    %c0_4 = arith.constant 0 : index
    %c0_5 = arith.constant 0 : index
    %9 = vector.load %arg5[%c0_4, %c0_5] : memref<1x128xf32, #tpu.memory_space<vmem>>, vector<1x128xf32>
    %10 = vector.broadcast %9 : vector<1x128xf32> to vector<96x128xf32>
    %11 = arith.addf %8, %10 : vector<96x128xf32>
    %cst_6 = arith.constant 0.000000e+00 : f32
    %12 = vector.broadcast %cst_6 : f32 to vector<96x128xf32>
    %13 = arith.maximumf %11, %12 : vector<96x128xf32>
    %14 = arith.truncf %13 : vector<96x128xf32> to vector<96x128xbf16>
    %c0_7 = arith.constant 0 : index
    %c0_8 = arith.constant 0 : index
    %15 = vector.load %arg6[%c0_7, %c0_8] : memref<96x128xbf16, #tpu.memory_space<vmem>>, vector<96x128xbf16>
    tpu.vector_store %arg6[%c0_7, %c0_8], %14 {strides = array<i32>} : memref<96x128xbf16, #tpu.memory_space<vmem>>, vector<96x128xbf16>,
    %16 = tpu.iota {dimensions = array<i32: 0>} : vector<96x1xi32>
    %c96_i32 = arith.constant 96 : i32
    %17 = arith.muli %1, %c96_i32 : i32
    %18 = vector.broadcast %17 : i32 to vector<96x1xi32>
    %19 = arith.addi %16, %18 : vector<96x1xi32>
    %c0_9 = arith.constant 0 : index
    %20 = memref.load %arg2[%c0_9] : memref<1xi32, #tpu.memory_space<smem>>
    %21 = vector.broadcast %20 : i32 to vector<96x1xi32>
    %22 = arith.cmpi slt, %19, %21 : vector<96x1xi32>
    %cst_10 = arith.constant 0.000000e+00 : f32
    %23 = vector.shape_cast %22 : vector<96x1xi1> to vector<96x1xi1>
    %24 = vector.broadcast %23 : vector<96x1xi1> to vector<96x128xi1>
    %25 = vector.broadcast %cst_10 : f32 to vector<96x128xf32>
    %26 = arith.select %24, %13, %25 : vector<96x128xi1>, vector<96x128xf32>
    %cst_11 = arith.constant 1.000000e+00 : f32
    %27 = vector.broadcast %cst_11 : f32 to vector<1x96xf32>
    %cst_12 = arith.constant dense<0.000000e+00> : vector<1x128xf32>
    %28 = tpu.matmul %27, %26, %cst_12 {dimension_numbers = #tpu.dot_dimension_numbers<[1], [0], [0], [1], [0, 0, 1, 1], [], []>} : vector<1x96xf32>, vector<96x128xf32>, vector<1x128xf32> -> vector<1x128xf32>
    %29 = arith.mulf %26, %26 : vector<96x128xf32>
    %cst_13 = arith.constant dense<0.000000e+00> : vector<1x128xf32>
    %30 = tpu.matmul %27, %29, %cst_13 {dimension_numbers = #tpu.dot_dimension_numbers<[1], [0], [0], [1], [0, 0, 1, 1], [], []>} : vector<1x96xf32>, vector<96x128xf32>, vector<1x128xf32> -> vector<1x128xf32>
    %c0_14 = arith.constant 0 : index
    %c0_15 = arith.constant 0 : index
    %c0_16 = arith.constant 0 : index
    %31 = vector.load %arg7[%c0_14, %c0_15, %c0_16] : memref<1x1x128xf32, #tpu.memory_space<vmem>>, vector<1x1x128xf32>
    %32 = vector.shape_cast %28 : vector<1x128xf32> to vector<1x1x128xf32>
    %33 = arith.addf %31, %32 : vector<1x1x128xf32>
    %c0_17 = arith.constant 0 : index
    %c0_18 = arith.constant 0 : index
    %c0_19 = arith.constant 0 : index
    %34 = vector.load %arg7[%c0_17, %c0_18, %c0_19] : memref<1x1x128xf32, #tpu.memory_space<vmem>>, vector<1x1x128xf32>
    tpu.vector_store %arg7[%c0_17, %c0_18, %c0_19], %33 {strides = array<i32>} : memref<1x1x128xf32, #tpu.memory_space<vmem>>, vector<1x1x128xf32>,
    %c0_20 = arith.constant 0 : index
    %c0_21 = arith.constant 0 : index
    %c0_22 = arith.constant 0 : index
    %35 = vector.load %arg8[%c0_20, %c0_21, %c0_22] : memref<1x1x128xf32, #tpu.memory_space<vmem>>, vector<1x1x128xf32>
    %36 = vector.shape_cast %30 : vector<1x128xf32> to vector<1x1x128xf32>
    %37 = arith.addf %35, %36 : vector<1x1x128xf32>
    %c0_23 = arith.constant 0 : index
    %c0_24 = arith.constant 0 : index
    %c0_25 = arith.constant 0 : index
    %38 = vector.load %arg8[%c0_23, %c0_24, %c0_25] : memref<1x1x128xf32, #tpu.memory_space<vmem>>, vector<1x1x128xf32>
    tpu.vector_store %arg8[%c0_23, %c0_24, %c0_25], %37 {strides = array<i32>} : memref<1x1x128xf32, #tpu.memory_space<vmem>>, vector<1x1x128xf32>,
    return
  }
  func.func @transform_0(%arg0: i32, %arg1: i32, %arg2: memref<1xi32, #tpu.memory_space<smem>>) -> (i32, i32) {
    %c2_i32 = arith.constant 2 : i32
    %0 = arith.muli %arg0, %c2_i32 : i32
    %1 = arith.addi %0, %arg1 : i32
    %c2_i32_0 = arith.constant 2 : i32
    %2 = arith.minsi %1, %c2_i32_0 : i32
    %c0_i32 = arith.constant 0 : i32
    %c0_i32_1 = arith.constant 0 : i32
    return %2, %c0_i32 : i32, i32
  }
  func.func @transform_1(%arg0: i32, %arg1: i32, %arg2: memref<1xi32, #tpu.memory_space<smem>>) -> (i32, i32) {
    %c0_i32 = arith.constant 0 : i32
    %c0_i32_0 = arith.constant 0 : i32
    %c0_i32_1 = arith.constant 0 : i32
    return %c0_i32, %c0_i32_0 : i32, i32
  }
  func.func @transform_2(%arg0: i32, %arg1: i32, %arg2: memref<1xi32, #tpu.memory_space<smem>>) -> (i32, i32) {
    %c0_i32 = arith.constant 0 : i32
    %c0_i32_0 = arith.constant 0 : i32
    %c0_i32_1 = arith.constant 0 : i32
    return %c0_i32, %c0_i32_0 : i32, i32
  }
  func.func @transform_3(%arg0: i32, %arg1: i32, %arg2: memref<1xi32, #tpu.memory_space<smem>>) -> (i32, i32) {
    %c2_i32 = arith.constant 2 : i32
    %0 = arith.muli %arg0, %c2_i32 : i32
    %1 = arith.addi %0, %arg1 : i32
    %c0_i32 = arith.constant 0 : i32
    %c0_i32_0 = arith.constant 0 : i32
    return %1, %c0_i32 : i32, i32
  }
  func.func @transform_4(%arg0: i32, %arg1: i32, %arg2: memref<1xi32, #tpu.memory_space<smem>>) -> (i32, i32, i32) {
    %c0_i32 = arith.constant 0 : i32
    %c0_i32_0 = arith.constant 0 : i32
    %c0_i32_1 = arith.constant 0 : i32
    return %arg0, %c0_i32, %c0_i32_0 : i32, i32, i32
  }
  func.func @transform_5(%arg0: i32, %arg1: i32, %arg2: memref<1xi32, #tpu.memory_space<smem>>) -> (i32, i32, i32) {
    %c0_i32 = arith.constant 0 : i32
    %c0_i32_0 = arith.constant 0 : i32
    %c0_i32_1 = arith.constant 0 : i32
    return %arg0, %c0_i32, %c0_i32_0 : i32, i32, i32
  }
}

</mosaic_0001>

<bundles_post_ra>
// kernel: tpu_custom_call.1
= control target key start
LH: loop header
LB: loop body
LE: loop exit
PB: predicated region body
PF: predicated region fallthrough
CT: control target
= control target key end

     0   :  { %s2041_s0 = inlined_call_operand.<no memory space> [shape: s32[1], index: 0, kind: input, shape index: {}]   ;;  %s2042_s1 = inlined_call_operand.vmem [shape: f32[200,64], index: 1, kind: input, shape index: {}]   ;;  %s2043_s2 = inlined_call_operand.vmem [shape: bf16[64,128], index: 2, kind: input, shape index: {}]   ;;  %s2044_s3 = inlined_call_operand.vmem [shape: f32[1,128], index: 3, kind: input, shape index: {}]   ;;  %s2045_s4 = inlined_call_operand.hbm [shape: bf16[384,128], index: 4, kind: output, shape index: {0}]   ;;  %s2046_s5 = inlined_call_operand.hbm [shape: f32[2,1,128], index: 5, kind: output, shape index: {1}]   ;;  %s2047_s6 = inlined_call_operand.hbm [shape: f32[2,1,128], index: 6, kind: output, shape index: {2}]  }
   0x1   :  { %2057 = sst [smem:[#allocation17_spill]] %s2042_s1 }
   0x2   :  { %12 = sst [smem:[#allocation3]] %s2041_s0 }
   0x3   :  { %13 = vsyncpa [#allocation5], 0 }
   0x4   :  { %15 = vsyncpa [#allocation5 + $0x1], 0 }
   0x5   :  { %16 = vsyncpa [#allocation7], 0 }
   0x6   :  { %18 = vsyncpa [#allocation7 + $0x1], 0  ;;  %s1566_s23 = smov 0   ;;  %s1568_s24 = smov 0  }
   0x7   :  { %s1570_s25 = smov 0   ;;  %s1572_s26 = smov 0  }
   0x8   :  { %s1574_s27 = smov 0   ;;  %s1576_s28 = smov 0  }
   0x9   :  { %s1578_s29 = smov 0   ;;  %s1580_s30 = smov 0  }
   0xa   :  { %s1582_s0 = smov 0   ;;  %s1584_s7 = smov 0  }
   0xb   :  { %s1586_s8 = smov 0  }
   0xc LB: > { %2058 = sst [smem:[#allocation11_spill]] %s1488_s26  ;;  %s2049_s9 = sadd.s32 4294967295, %s1516_s8   ;;  %s1516_s8 = sphi %s1586_s8, %s24_s8   ;;  %s1512_s7 = sphi %s1584_s7, %s2083_s7   ;;  %s1508_s0 = sphi %s1582_s0, %s2090_s0   ;;  %s1504_s30 = sphi %s1580_s30, %s2081_s30   ;;  %s1500_s29 = sphi %s1578_s29, %s2080_s29   ;;  %s1496_s28 = sphi %s1576_s28, %s2089_s28   ;;  %s1492_s27 = sphi %s1574_s27, %s2088_s27   ;;  %s1488_s26 = sphi %s1572_s26, %s2087_s26   ;;  %s1484_s25 = sphi %s1570_s25, %s2086_s25   ;;  %s1480_s24 = sphi %s1568_s24, %s2085_s24   ;;  %s1476_s23 = sphi %s1566_s23, %s2084_s23  }
   0xd   : > { %2059 = sst [smem:[#allocation12_spill]] %s1508_s0  ;;  %s2048_s10 = sadd.s32 4294967294, %s1516_s8  }
   0xe   : > { %2060 = sst [smem:[#allocation13_spill]] %s1512_s7  ;;  %s33_s11 = sadd.s32 1, %s1508_s0 }
   0xf   : > { %s36_s12 = sadd.s32 1, %s1512_s7  ;;  %p34_p0 = scmp.ge.s32.totalorder %s33_s11, 2 }
  0x10   : > { %s969_s13 = sshll.u32 %s1512_s7, 1  ;;  %s123_s15 = sadd.s32 1, %s1496_s28 }
  0x11   : > { %s117_s14 = sadd.s32 %s1508_s0, %s969_s13  ;;  %s2092_s11 = smov (%p34_p0, %s33_s11), 0 }
  0x12   : > { %2061 = sst [smem:[#allocation14_spill]] %s2092_s11  ;;  %s2094_s12 = smov (!%p34_p0, %s36_s12), %s1512_s7 }
  0x13   : > { %p133_p1 = scmp.ne.s32.totalorder %s1496_s28, %s1492_s27  ;;  %p1635_p2 = scmp.eq.s32.totalorder %s2049_s9, 3 }
  0x14   : > { %p38_p3 = scmp.ge.s32.totalorder %s2094_s12, 2  ;;  %p139_p4 = scmp.ne.s32.totalorder %s1492_s27, %s1488_s26 }
  0x15   : > { %p1643_p5 = por %p1635_p2, %p133_p1  ;;  %p1649_p6 = scmp.eq.s32.totalorder %s2048_s10, 3 }
  0x16   : > { %s2096_s12 = smov (%p38_p3, %s2094_s12), 0  ;;  %s149_s20 = sadd.s32 1, %s1484_s25 }
  0x17   : > { %2065 = sst [smem:[#allocation15_spill]] %s2096_s12  ;;  %p1657_p7 = por %p1649_p6, %p139_p4 }
  0x18   : > { %s970_s21 = sshll.u32 %s2096_s12, 1  ;;  %s146_s22 = ssub.s32 %s1512_s7, %s2096_s12 }
  0x19   : > { %s2066_s19 = scalar_select %p1657_p7, 1, 0 }
  0x1a   : > { %s119_s13 = sadd.s32 %s970_s21, %s2092_s11  ;;  %p147_p8 = scmp.eq.s32.totalorder %s146_s22, 0 }
  0x1b   : > { %2067 = sst [smem:[#allocation16_spill]] %s2066_s19  ;;  %s120_s10 = ssub.s32 %s117_s14, %s119_s13 }
  0x1c   : > { %p159_p9 = scmp.ne.s32.totalorder %s1484_s25, %s1480_s24  ;;  %p121_p10 = scmp.eq.s32.totalorder %s120_s10, 0 }
  0x1d   : > { %p165_p11 = scmp.ne.s32.totalorder %s1480_s24, %s1476_s23  ;;  %p973_p0 = scmp.ge.s32.totalorder %s1516_s8, 1 }
  0x1e   : > { %s1671_s9 = scalar_select %p147_p8, %s1484_s25, %s149_s20  }
  0x1f   : > { %s1674_s0 = scalar_select %p121_p10, %s1496_s28, %s123_s15  }
  0x20   : > { %p1678_p12 = por %p159_p9, %p1635_p2  ;;  %p1684_p13 = por %p165_p11, %p1649_p6 }
  0x21   : > { %p241_p1 = scmp.lt.s32.totalorder %s1516_s8, 5 }
  0x23   : > { %p242_p3 = pnand %p973_p0, %p241_p1 }
  0x24   : > { %s2056_s23 = sand.u32 (!%p242_p3), 1, %s1492_s27   ;;  %s277_s10 = sand.u32 (!%p242_p3), 1, %s1480_s24  }
  0x25   : > { %245 = sbr.rel (%p242_p3) target bundleno = 571 (0x23b), region = 32  ;;  %s974_s15 = sshll.u32 (!%p242_p3), %s1504_s30, 1 }
  0x26   : > { %s1221_s14 = smul.u32 (!%p242_p3), 48, %s2056_s23  ;;  %s1696_s16 = sadd.s32 (!%p242_p3), %s1500_s29, %s974_s15 }
  0x27   : > { %p287_p2 = scmp.lt.s32.totalorder (!%p242_p3), %s1696_s16, 2  ;;  %s2070_s1 = sld [smem:[#allocation17_spill]] (!%p242_p3) }
  0x28   : > { %s1705_s11 = scalar_lea.vmem (!%p242_p3), [#allocation4], %s1221_s14  ;;  %s1707_s7 = scalar_lea.vmem (!%p242_p3), [#allocation6], %s277_s10 }
  0x29   : > { %s1709_s23 = scalar_lea.vmem (!%p242_p3), [#allocation8], %s277_s10  ;;  %p977_p6 = scmp.ne.s32.totalorder (!%p242_p3), %s1500_s29, 0 }
  0x2c   : > { %s288_s18 = scalar_select %p287_p2, %s1696_s16, 2 }
  0x2d   : > { %v1518_v0 = vmov (!%p977_p6), 0.0  }
  0x2e   : > { %s289_s20 = smul.u32 12, %s288_s18  ;;  %317 = vst [vmem:[%s1707_s7] sm:$0x1] (!%p977_p6), %v1518_v0  ;;  %318 = vst [vmem:[%s1709_s23] sm:$0x1] (!%p977_p6), %v1518_v0 }
  0x2f   : > { %316 = sbr.rel (%p977_p6) target bundleno = 54 (0x36), region = 36 }
  0x30   : > { %p294_p4 = scmp.lt.s32.totalorder %s289_s20, 24 }
  0x32   : > { %s2098_s20 = smov (!%p294_p4, %s289_s20), 24 }
  0x33   : > { %s975_s21 = sshll.u32 %s2098_s20, 3 }
  0x34   : > { %s1703_s12 = scalar_lea.vmem %s2070_s1, %s975_s21 }
  0x36 PF: > { %v1334_v1 = vld [vmem:[%s2043_s2] sm:$0xff]   ;;  %v1335_v2 = vld [vmem:[%s2043_s2 + $0x8] sm:$0xff]   ;;  %v1336_v3 = vld [vmem:[%s2043_s2 + $0x10] sm:$0xff]   ;;  %vm376_vm0 = vcmask 523264   ;;  %v1519_v23 = vmov 0.0|0.0   ;;  %vm1520_vm1 = vmmov 0   ;;  %v548_v25 = vlaneseq }
  0x37   : > { %1105 = vmatprep.subr.bf16.mxu0 %v1334_v1  ;;  %v319_v4 = vld [vmem:[%s1703_s12] sm:$0xff]  ;;  %v320_v5 = vld [vmem:[%s1703_s12 + $0x8] sm:$0xff]  ;;  %v1337_v7 = vld [vmem:[%s2043_s2 + $0x18] sm:$0xff]   ;;  %1179 = vmatprep.subr.bf16.mxu1 %v1519_v23  ;;  %v1521_v24 = vmov 0.0   ;;  %s561_s13 = smul.u32 96, %s1696_s16  ;;  %s575_s15 = sld [smem:[#allocation3]] }
  0x38   : > { %1106 = vmatpush3.bf16.msra.mxu0 %v1334_v1  ;;  %v331_v6 = vpack.c.bf16 %v320_v5, %v319_v4  ;;  %v321_v8 = vld [vmem:[%s1703_s12 + $0x10] sm:$0xff]  ;;  %v322_v9 = vld [vmem:[%s1703_s12 + $0x18] sm:$0xff]  ;;  %v323_v10 = vld [vmem:[%s1703_s12 + $0x20] sm:$0xff]  ;;  %1149 = vmatprep.mubr.msk.f32.mxu1 %vm1520_vm1, %v1521_v24  ;;  %v1746_v26 = vshrl.u32 %v548_v25, 7  ;;  %s1033_s14 = smul.u32 768, %s1696_s16  ;;  %s811_s20 = sshll.u32 %s1705_s11, 4  ;;  %s1895_s20 = int_to_ptr.vmem [resolvable:$true] %s811_s20 }
  0x39   : > { %1107 = vmatprep.subr.bf16.mxu0 %v1335_v2  ;;  %v324_v11 = vld [vmem:[%s1703_s12 + $0x28] sm:$0xff]  ;;  %v332_v12 = vpack.c.bf16 %v322_v9, %v321_v8  ;;  %v325_v14 = vld [vmem:[%s1703_s12 + $0x30] sm:$0xff]  ;;  %v326_v15 = vld [vmem:[%s1703_s12 + $0x38] sm:$0xff]  ;;  %v1750_v28 = vstv %s561_s13  ;;  %s2075_s22 = sand.u32 1, %s1492_s27   ;;  %s1523_s16 = smov [#allocation4]  }
  0x3a   : > { %1113 = vmatprep.mubr.msk.bf16.mxu0 %vm376_vm0, %v331_v6  ;;  %v333_v13 = vpack.c.bf16 %v324_v11, %v323_v10  ;;  %v327_v16 = vld [vmem:[%s1703_s12 + $0x40] sm:$0xff]  ;;  %v328_v17 = vld [vmem:[%s1703_s12 + $0x48] sm:$0xff]  ;;  %v334_v18 = vpack.c.bf16 %v326_v15, %v325_v14  ;;  %v329_v20 = vld [vmem:[%s1703_s12 + $0x50] sm:$0xff]  ;;  %v551_v27 = vadd.s32 16, %v1746_v26  ;;  %v552_v29 = vadd.s32 24, %v1746_v26  ;;  %s1900_s21 = scalar_lea.hbm %s2045_s4, %s1033_s14  ;;  %s1904_s13 = scalar_lea.sflag [#allocation5], %s2075_s22 }
  0x3b   : > { %v335_v19 = vpack.c.bf16 %v328_v17, %v327_v16  ;;  %v330_v21 = vld [vmem:[%s1703_s12 + $0x58] sm:$0xff]  ;;  %v550_v30 = vadd.s32 8, %v1746_v26  ;;  %v1758_v32 = vld [vmem:[%s2044_s3] ss:$0 sm:$0xff]  ;;  %v555_v34 = vadd.s32 48, %v1746_v26  ;;  %v563_v35 = vadd.s32 %v1750_v28, %v1746_v26 }
  0x3c   : > { %1108 = vmatpush3.bf16.msra.mxu0 %v1335_v2  ;;  %v336_v22 = vpack.c.bf16 %v330_v21, %v329_v20  ;;  %v565_v31 = vadd.s32 %v1750_v28, %v551_v27  ;;  %v553_v36 = vadd.s32 32, %v1746_v26  ;;  %v566_v38 = vadd.s32 %v1750_v28, %v552_v29 }
  0x3d   : > { %1109 = vmatprep.subr.bf16.mxu0 %v1336_v3  ;;  %v1760_v33 = vstv %s575_s15  ;;  %v564_v39 = vadd.s32 %v1750_v28, %v550_v30  ;;  %v1772_v44 = vadd.s32 %v1750_v28, %v555_v34  ;;  %v556_v45 = vadd.s32 56, %v1746_v26  ;;  %s1338_s15 = scalar_lea.vmem %s1895_s20, 768 }
  0x3e   : > { %vm579_vm2 = vcmp.lt.s32.totalorder %v565_v31, %v1760_v33  ;;  %vm577_vm3 = vcmp.lt.s32.totalorder %v563_v35, %v1760_v33  ;;  %v567_v49 = vadd.s32 %v1750_v28, %v553_v36  ;;  %v554_v50 = vadd.s32 40, %v1746_v26  ;;  %p1339_p8 = scmp.ne.s32.totalorder %s1895_s20, %s1338_s15 }
  0x3f   : > { %vm580_vm4 = vcmp.lt.s32.totalorder %v566_v38, %v1760_v33  ;;  %vm578_vm5 = vcmp.lt.s32.totalorder %v564_v39, %v1760_v33  ;;  %vm583_vm6 = vcmp.lt.s32.totalorder %v1772_v44, %v1760_v33  ;;  %v1787_v56 = vadd.s32 %v1750_v28, %v556_v45 }
  0x40   : > { %1110 = vmatpush3.bf16.msra.mxu0 %v1336_v3  ;;  %vm581_vm7 = vcmp.lt.s32.totalorder %v567_v49, %v1760_v33  ;;  %vm1798_vm8 = vmpackc.low %vm578_vm5, %vm577_vm3  ;;  %v568_v61 = vadd.s32 %v1750_v28, %v554_v50  ;;  %v557_v11 = vadd.s32 64, %v1746_v26  ;;  %v558_v17 = vadd.s32 72, %v1746_v26  ;;  %p1340_p9 = pnand %p1339_p8, %p1643_p5 }
  0x41   : > { %1111 = vmatprep.subr.bf16.mxu0 %v1337_v7  ;;  %vm1185_vm9 = vmpackc.low %vm580_vm4, %vm579_vm2  ;;  %vm584_vm10 = vcmp.lt.s32.totalorder %v1787_v56, %v1760_v33 }
  0x42   : > { %vm582_vm11 = vcmp.lt.s32.totalorder %v568_v61, %v1760_v33  ;;  %v572_v34 = vadd.s32 %v1750_v28, %v558_v17  ;;  %vm1193_vm15 = vmpackc.low %vm584_vm10, %vm583_vm6  ;;  %p1341_p10 = pneg %p1340_p9 }
  0x43   : > { %vm1844_vm12 = vmpackc.low %vm582_vm11, %vm581_vm7 }
  0x44   : > { %1112 = vmatpush3.bf16.msra.mxu0 %v1337_v7  ;;  %v559_v7 = vadd.s32 80, %v1746_v26 }
  0x45   : > { %1203 = vmatprep.subr.bf16.mxu0 %v1519_v23 }
  0x46   : > { %v1831_v25 = vadd.s32 %v1750_v28, %v559_v7 }
  0x47   : > { %1114 = vmatmul.mubr.msk.bf16.vlgmr.msra.gmra.mrb[0].mxu0 %vm376_vm0, %v332_v12  ;;  %v560_v12 = vadd.s32 88, %v1746_v26  ;;  %v571_v26 = vadd.s32 %v1750_v28, %v557_v11 }
  0x48   : > { %1117 = vmatprep.mubr.msk.bf16.mxu0 %vm376_vm0, %v333_v13  ;;  %vm587_vm13 = vcmp.lt.s32.totalorder %v1831_v25, %v1760_v33 }
  0x49   : > { %v574_v30 = vadd.s32 %v1750_v28, %v560_v12  ;;  %vm585_vm14 = vcmp.lt.s32.totalorder %v571_v26, %v1760_v33 }
  0x4f   : > { %1118 = vmatmul.mubr.msk.bf16.gmra.mrb[4].mxu0 %vm376_vm0, %v334_v18 }
  0x50   : > { %1121 = vmatprep.mubr.msk.bf16.mxu0 %vm376_vm0, %v335_v19 }
  0x57   : > { %1122 = vmatmul.mubr.msk.bf16.gmra.mrb[8].mxu0 %vm376_vm0, %v336_v22  ;;  %vm588_vm0 = vcmp.lt.s32.totalorder %v574_v30, %v1760_v33 }
  0x58   : > { %1176 = vmatprep.mubr.msk.f32.mxu0 %vm1520_vm1, %v1521_v24  ;;  %vm586_vm1 = vcmp.lt.s32.totalorder %v572_v34, %v1760_v33 }
 0x11a   : > { %v1115_v37 = vpop.f32.mrb[0].mxu0 }
 0x11b   : > { %v438_v40 = vadd.f32 %v1115_v37, %v1758_v32  ;;  %v429_v41 = vpop.f32.mrb[1].mxu0 }
 0x11c   : > { %v430_v42 = vadd.f32 %v1758_v32, %v429_v41  ;;  %v1116_v43 = vpop.f32.mrb[2].mxu0 }
 0x11d   : > { %v478_v46 = vmax.f32 %v438_v40, 0.0  ;;  %v441_v47 = vadd.f32 %v1116_v43, %v1758_v32  ;;  %v432_v48 = vpop.f32.mrb[3].mxu0 }
 0x11e   : > { %v476_v51 = vmax.f32 %v430_v42, 0.0  ;;  %v433_v52 = vadd.f32 %v1758_v32, %v432_v48 }
 0x11f   : > { %v615_v53 = vsel %vm579_vm2, %v478_v46, 0.0  ;;  %v479_v54 = vmax.f32 %v441_v47, 0.0  ;;  %vm1197_vm2 = vmpackc.low %vm586_vm1, %vm585_vm14 }
 0x120   : > { %v477_v55 = vmax.f32 %v433_v52, 0.0  ;;  %v613_v57 = vsel %vm577_vm3, %v476_v51, 0.0  ;;  %v701_v62 = vmul.f32 %v615_v53, %v615_v53  ;;  %vm1201_vm3 = vmpackc.low %vm588_vm0, %vm587_vm13 }
 0x121   : > { %v1042_v58 = vpack.c.bf16 %v479_v54, %v478_v46  ;;  %v616_v59 = vsel %vm580_vm4, %v479_v54, 0.0  ;;  %v699_v5 = vmul.f32 %v613_v57, %v613_v57  ;;  %vm625_vm4 = vcmask 785408  }
 0x122   : > { %v702_v63 = vmul.f32 %v616_v59, %v616_v59  ;;  %v1037_v0 = vpack.c.bf16 %v477_v55, %v476_v51  ;;  %v1119_v1 = vpop.f32.mrb[4].mxu0  ;;  %v614_v2 = vsel %vm578_vm5, %v477_v55, 0.0 }
 0x123   : > { %1064 = vst [vmem:[%s1705_s11 + $0x8] sm:$0xff] %v1042_v58   ;;  %v454_v3 = vadd.f32 %v1119_v1, %v1758_v32  ;;  %v445_v4 = vpop.f32.mrb[5].mxu0  ;;  %v700_v6 = vmul.f32 %v614_v2, %v614_v2  ;;  %v1522_v1 = vmov 1.0  }
 0x124   : > { %v1207_v8 = vpack.c.bf16 %v702_v63, %v701_v62  ;;  %1038 = vst [vmem:[%s1705_s11] sm:$0xff] %v1037_v0   ;;  %v446_v9 = vadd.f32 %v1758_v32, %v445_v4  ;;  %v1120_v10 = vpop.f32.mrb[6].mxu0  ;;  %1182 = vmatpush3.bf16.msk.msra.mxu1 %vm1798_vm8, %v1037_v0 }
 0x125   : > { %v482_v13 = vmax.f32 %v454_v3, 0.0  ;;  %v457_v14 = vadd.f32 %v1120_v10, %v1758_v32  ;;  %v1204_v15 = vpack.c.bf16 %v700_v6, %v699_v5  ;;  %v448_v16 = vpop.f32.mrb[7].mxu0  ;;  %1183 = vmatprep.subr.bf16.mxu1 %v1519_v23 }
 0x126   : > { %v480_v18 = vmax.f32 %v446_v9, 0.0  ;;  %v449_v19 = vadd.f32 %v1758_v32, %v448_v16 }
 0x127   : > { %v619_v20 = vsel %vm583_vm6, %v482_v13, 0.0  ;;  %v483_v21 = vmax.f32 %v457_v14, 0.0  ;;  %1205 = vmatpush3.bf16.msra.mxu0 %v1204_v15 }
 0x128   : > { %v617_v22 = vsel %vm581_vm7, %v480_v18, 0.0  ;;  %v481_v24 = vmax.f32 %v449_v19, 0.0  ;;  %1186 = vmatpush3.bf16.msk.msra.mxu1 %vm1185_vm9, %v1042_v58  ;;  %1206 = vmatprep.subr.bf16.mxu0 %v1519_v23  ;;  %v705_v35 = vmul.f32 %v619_v20, %v619_v20 }
 0x129   : > { %v1052_v27 = vpack.c.bf16 %v483_v21, %v482_v13  ;;  %v620_v29 = vsel %vm584_vm10, %v483_v21, 0.0  ;;  %1187 = vmatprep.subr.bf16.mxu1 %v1519_v23  ;;  %v703_v40 = vmul.f32 %v617_v22, %v617_v22 }
 0x12a   : > { %v706_v36 = vmul.f32 %v620_v29, %v620_v29  ;;  %v1047_v37 = vpack.c.bf16 %v481_v24, %v480_v18  ;;  %v618_v38 = vsel %vm582_vm11, %v481_v24, 0.0  ;;  %v1123_v39 = vpop.f32.mrb[8].mxu0 }
 0x12b   : > { %1066 = vst [vmem:[%s1705_s11 + $0x18] sm:$0xff] %v1052_v27   ;;  %v704_v41 = vmul.f32 %v618_v38, %v618_v38  ;;  %v470_v42 = vadd.f32 %v1123_v39, %v1758_v32  ;;  %v461_v43 = vpop.f32.mrb[9].mxu0  ;;  %1208 = vmatpush3.bf16.msra.mxu0 %v1207_v8 }
 0x12c   : > { %v1213_v45 = vpack.c.bf16 %v706_v36, %v705_v35  ;;  %1065 = vst [vmem:[%s1705_s11 + $0x10] sm:$0xff] %v1047_v37   ;;  %v462_v28 = vadd.f32 %v1758_v32, %v461_v43  ;;  %v1124_v46 = vpop.f32.mrb[10].mxu0  ;;  %1190 = vmatpush3.bf16.msk.msra.mxu1 %vm1844_vm12, %v1047_v37  ;;  %1209 = vmatprep.subr.bf16.mxu0 %v1519_v23 }
 0x12d   : > { %v1210_v47 = vpack.c.bf16 %v704_v41, %v703_v40  ;;  %v486_v48 = vmax.f32 %v470_v42, 0.0  ;;  %v473_v49 = vadd.f32 %v1124_v46, %v1758_v32  ;;  %v464_v50 = vpop.f32.mrb[11].mxu0  ;;  %1191 = vmatprep.subr.bf16.mxu1 %v1519_v23 }
 0x12e   : > { %v484_v51 = vmax.f32 %v462_v28, 0.0  ;;  %v465_v52 = vadd.f32 %v1758_v32, %v464_v50 }
 0x12f   : > { %v623_v53 = vsel %vm587_vm13, %v486_v48, 0.0  ;;  %v487_v54 = vmax.f32 %v473_v49, 0.0  ;;  %1211 = vmatpush3.bf16.msra.mxu0 %v1210_v47 }
 0x130   : > { %v621_v44 = vsel %vm585_vm14, %v484_v51, 0.0  ;;  %v485_v55 = vmax.f32 %v465_v52, 0.0  ;;  %1194 = vmatpush3.bf16.msk.msra.mxu1 %vm1193_vm15, %v1052_v27  ;;  %1212 = vmatprep.subr.bf16.mxu0 %v1519_v23  ;;  %v709_v57 = vmul.f32 %v623_v53, %v623_v53 }
 0x131   : > { %v1062_v56 = vpack.c.bf16 %v487_v54, %v486_v48  ;;  %v624_v32 = vsel %vm588_vm0, %v487_v54, 0.0  ;;  %1195 = vmatprep.subr.bf16.mxu1 %v1519_v23  ;;  %v707_v61 = vmul.f32 %v621_v44, %v621_v44 }
 0x132   : > { %v710_v58 = vmul.f32 %v624_v32, %v624_v32  ;;  %v1057_v59 = vpack.c.bf16 %v485_v55, %v484_v51  ;;  %v622_v60 = vsel %vm586_vm1, %v485_v55, 0.0 }
 0x133   : > { %1068 = vst [vmem:[%s1705_s11 + $0x28] sm:$0xff] %v1062_v56   ;;  %v708_v62 = vmul.f32 %v622_v60, %v622_v60  ;;  %1214 = vmatpush3.bf16.msra.mxu0 %v1213_v45 }
 0x134   : > { %v1219_v63 = vpack.c.bf16 %v710_v58, %v709_v57  ;;  %1067 = vst [vmem:[%s1705_s11 + $0x20] sm:$0xff] %v1057_v59   ;;  %1198 = vmatpush3.bf16.msk.msra.mxu1 %vm1197_vm2, %v1057_v59  ;;  %1215 = vmatprep.subr.bf16.mxu0 %v1519_v23  ;;  %s1342_s11 = sshll.u32 %s1523_s16, 4  ;;  %s1343_s11 = int_to_ptr.vmem [resolvable:$false] %s1342_s11 }
 0x135   : > { %v1216_v0 = vpack.c.bf16 %v708_v62, %v707_v61  ;;  %1199 = vmatprep.subr.bf16.mxu1 %v1519_v23  ;;  %s1344_s12 = scalar_lea.vmem %s1343_s11, 1536  ;;  %p1345_p11 = scmp.lt.s32.totalorder %s1895_s20, %s1343_s11 }
 0x136   : > { %p1346_p0 = scmp.lt.s32.totalorder %s1344_s12, %s1338_s15 }
 0x137   : > { %1217 = vmatpush3.bf16.msra.mxu0 %v1216_v0 }
 0x138   : > { %1202 = vmatpush3.bf16.msk.msra.mxu1 %vm1201_vm3, %v1062_v56  ;;  %1218 = vmatprep.subr.bf16.mxu0 %v1519_v23  ;;  %p1347_p1 = por %p1346_p0, %p1345_p11 }
 0x13a   : > { %p1348_p3 = pnand %p1347_p1, %p1341_p10 }
 0x13b   : > { %1220 = vmatpush3.bf16.msra.mxu0 %v1219_v63  ;;  %1150 = vmatmul.mubr.msk.f32.vlgmr.msra.gmra.mrb[0].mxu1 %vm625_vm4, %v1522_v1 }
 0x13e   : > { %1177 = vmatmul.mubr.msk.f32.vlgmr.msra.gmra.mrb[12].mxu0 %vm625_vm4, %v1522_v1 }
 0x13f   : > { %1351 = shalt.err (!%p1348_p3)
}
 0x140   : > { %s1352_s18 = scalar_lea.hbm %s1900_s21, 768  ;;  %s1356_s10 = scalar_lea.hbm %s2045_s4, 3072 }
 0x141   : > { %p1353_p2 = scmp.ne.s32.totalorder %s1900_s21, %s1352_s18  ;;  %p1357_p8 = scmp.lt.u32.totalorder %s1900_s21, %s2045_s4 }
 0x142   : > { %p1358_p9 = scmp.lt.u32.totalorder %s1356_s10, %s1352_s18  ;;  %p1360_p11 = scmp.lt.u32.totalorder %s1352_s18, %s1900_s21 }
 0x143   : > { %p1354_p4 = pnand %p1353_p2, %p1643_p5 }
 0x144   : > { %p1359_p10 = por %p1358_p9, %p1357_p8 }
 0x145   : > { %p1355_p6 = pneg %p1354_p4 }
 0x146   : > { %p1361_p0 = por %p1360_p11, %p1359_p10 }
 0x148   : > { %p1362_p1 = pnand %p1361_p0, %p1355_p6 }
 0x14a   : > { %1365 = shalt.err (!%p1362_p1)
}
 0x14b   : > { %s1524_s15 = smov 64   ;;  %s1525_s11 = smov 4   ;;  %v781_v23 = vld [vmem:[%s1707_s7] sm:$0x1] }
 0x14c   : > { %1222 = dma.vmem_to_hbm [thread:$0]  (%p1643_p5), %s1895_s20, 768, %s1900_s21, %s1904_s13, %s1524_s15, %s1524_s15, %s1525_s11  }
 0x14d   : > { %s2076_s12 = sadd.s32 4294967295, %s1516_s8   ;;  %s1017_s14 = sshll.u32 %s1504_s30, 4  ;;  %v784_v4 = vld [vmem:[%s1709_s23] sm:$0x1] }
 0x14e   : > { %s1930_s18 = sand.u32 1, %s2076_s12   ;;  %s827_s29 = sshll.u32 %s1707_s7, 4  ;;  %s1942_s29 = int_to_ptr.vmem [resolvable:$true] %s827_s29 }
 0x14f   : > { %s840_s10 = sshll.u32 %s1709_s23, 4  ;;  %s1940_s1 = scalar_lea.hbm %s2046_s5, %s1017_s14  ;;  %s1950_s10 = int_to_ptr.vmem [resolvable:$true] %s840_s10 }
 0x150   : > { %s1948_s20 = scalar_lea.hbm %s2047_s6, %s1017_s14  ;;  %s793_s21 = scalar_lea.sflag [#allocation7], %s1930_s18 }
 0x151   : > { %s1366_s13 = scalar_lea.vmem %s1942_s29, 16  ;;  %s1526_s15 = smov [#allocation6]  }
 0x152   : > { %p1367_p5 = scmp.ne.s32.totalorder %s1942_s29, %s1366_s13  ;;  %s1370_s11 = sshll.u32 %s1526_s15, 4  ;;  %s1371_s11 = int_to_ptr.vmem [resolvable:$false] %s1370_s11 }
 0x153   : > { %p1373_p4 = scmp.lt.s32.totalorder %s1942_s29, %s1371_s11 }
 0x154   : > { %p1368_p3 = pnand %p1367_p5, %p1678_p12 }
 0x156   : > { %p1369_p2 = pneg %p1368_p3 }
 0x20e   : > { %v695_v33 = vpop.f32.mrb[0].mxu1 }
 0x20f   : > { %v782_v2 = vadd.f32 %v781_v23, %v695_v33  ;;  %v1151_v3 = vpop.f32.mrb[1].mxu1 }
 0x211   : > { %783 = vst [vmem:[%s1707_s7] sm:$0x1] %v782_v2  ;;  %v777_v5 = vpop.f32.mrb[12].mxu0  ;;  %s1372_s7 = scalar_lea.vmem %s1371_s11, 32 }
 0x212   : > { %v785_v6 = vadd.f32 %v784_v4, %v777_v5  ;;  %v1178_v7 = vpop.f32.mrb[13].mxu0  ;;  %p1374_p6 = scmp.lt.s32.totalorder %s1372_s7, %s1366_s13 }
 0x214   : > { %p1375_p8 = por %p1374_p6, %p1373_p4 }
 0x216   : > { %p1376_p9 = pnand %p1375_p8, %p1369_p2 }
 0x218   : > { %1379 = shalt.err (!%p1376_p9)
}
 0x219   : > { %s1380_s12 = scalar_lea.hbm %s1940_s1, 16  ;;  %s1384_s16 = scalar_lea.hbm %s2046_s5, 32 }
 0x21a   : > { %p1381_p10 = scmp.ne.s32.totalorder %s1940_s1, %s1380_s12  ;;  %p1385_p1 = scmp.lt.u32.totalorder %s1940_s1, %s2046_s5 }
 0x21b   : > { %p1386_p5 = scmp.lt.u32.totalorder %s1384_s16, %s1380_s12  ;;  %p1388_p2 = scmp.lt.u32.totalorder %s1380_s12, %s1940_s1 }
 0x21c   : > { %p1382_p11 = pnand %p1381_p10, %p1678_p12 }
 0x21d   : > { %p1387_p3 = por %p1386_p5, %p1385_p1 }
 0x21e   : > { %p1383_p0 = pneg %p1382_p11 }
 0x21f   : > { %p1389_p4 = por %p1388_p2, %p1387_p3 }
 0x221   : > { %p1390_p6 = pnand %p1389_p4, %p1383_p0 }
 0x223   : > { %1393 = shalt.err (!%p1390_p6)
}
 0x224   : > { %1223 = dma.vmem_to_hbm [thread:$0]  (%p1678_p12), %s1942_s29, 16, %s1940_s1, %s793_s21   ;;  %786 = vst [vmem:[%s1709_s23] sm:$0x1] %v785_v6 }
 0x225   : > { %s1394_s13 = scalar_lea.vmem %s1950_s10, 16  ;;  %s1527_s15 = smov [#allocation8]  }
 0x226   : > { %p1395_p8 = scmp.ne.s32.totalorder %s1950_s10, %s1394_s13  ;;  %s1398_s11 = sshll.u32 %s1527_s15, 4  ;;  %s1399_s11 = int_to_ptr.vmem [resolvable:$false] %s1398_s11 }
 0x227   : > { %s1400_s7 = scalar_lea.vmem %s1399_s11, 32  ;;  %p1401_p11 = scmp.lt.s32.totalorder %s1950_s10, %s1399_s11 }
 0x228   : > { %p1396_p9 = pnand %p1395_p8, %p1678_p12  ;;  %p1402_p0 = scmp.lt.s32.totalorder %s1400_s7, %s1394_s13 }
 0x22a   : > { %p1397_p10 = pneg %p1396_p9  ;;  %p1403_p1 = por %p1402_p0, %p1401_p11 }
 0x22c   : > { %p1404_p5 = pnand %p1403_p1, %p1397_p10 }
 0x22e   : > { %1407 = shalt.err (!%p1404_p5)
}
 0x22f   : > { %s1408_s1 = scalar_lea.hbm %s1948_s20, 16  ;;  %s1412_s12 = scalar_lea.hbm %s2047_s6, 32 }
 0x230   : > { %p1409_p3 = scmp.ne.s32.totalorder %s1948_s20, %s1408_s1  ;;  %p1413_p6 = scmp.lt.u32.totalorder %s1948_s20, %s2047_s6 }
 0x231   : > { %p1414_p8 = scmp.lt.u32.totalorder %s1412_s12, %s1408_s1  ;;  %p1416_p10 = scmp.lt.u32.totalorder %s1408_s1, %s1948_s20 }
 0x232   : > { %p1410_p2 = pnand %p1409_p3, %p1678_p12 }
 0x233   : > { %p1415_p9 = por %p1414_p8, %p1413_p6 }
 0x234   : > { %p1411_p4 = pneg %p1410_p2 }
 0x235   : > { %p1417_p11 = por %p1416_p10, %p1415_p9 }
 0x237   : > { %p1418_p0 = pnand %p1417_p11, %p1411_p4 }
 0x239   : > { %1421 = shalt.err (!%p1418_p0)
}
 0x23a   : > { %1224 = dma.vmem_to_hbm [thread:$0]  (%p1678_p12), %s1950_s10, 16, %s1948_s20, %s793_s21  }
 0x23b PF: > { %s2077_s16 = sld [smem:[#allocation11_spill]]  ;;  %p1238_p1 = scmp.ge.s32.totalorder %s1516_s8, 2 }
 0x23d   : > { %p1229_p5 = pnand %p1238_p1, %p1657_p7 }
 0x241   : > { %s852_s17 = sand.u32 1, %s2077_s16  }
 0x242   : > { %s853_s13 = scalar_lea.sflag [#allocation5], %s852_s17 }
 0x243   : > { %1467 = dma.done.wait (!%p1229_p5), %s853_s13, 768  }
 0x244   : > { %1469 = vsyncadd (!%p1229_p5), %s853_s13, 4294966528  ;;  %s2079_s15 = sadd.s32 4294967294, %s1516_s8   ;;  %p1232_p3 = pnand %p1238_p1, %p1684_p13 }
 0x245   : > { %s861_s26 = sand.u32 1, %s2079_s15  }
 0x246   : > { %s862_s18 = scalar_lea.sflag [#allocation7], %s861_s26 }
 0x247   : > { %1471 = dma.done.wait (!%p1232_p3), %s862_s18, 32  }
 0x248   : > { %1473 = vsyncadd (!%p1232_p3), %s862_s18, 4294967264  ;;  %s24_s8 = sadd.s32 1, %s1516_s8   ;;  %s2080_s29 = sld [smem:[#allocation12_spill]] }
 0x249   : > { %p21_p12 = scmp.ge.s32.totalorder %s24_s8, 6   ;;  %s2081_s30 = sld [smem:[#allocation13_spill]] }
 0x24a   : > { %s2082_s10 = sld [smem:[#allocation14_spill]]  ;;  %s2083_s7 = sld [smem:[#allocation15_spill]] }
 0x24b   : > { %s2084_s23 = smov %s1480_s24  ;;  %s2085_s24 = smov %s1484_s25 }
 0x24c   : > { %s2086_s25 = smov %s1671_s9  ;;  %s2087_s26 = smov %s1492_s27 }
 0x24d   : > { %s2088_s27 = smov %s1496_s28  ;;  %s2089_s28 = smov %s1674_s0 }
 0x24e   :  { %23 = sbr.rel (!%p21_p12) target bundleno = 12 (0xc), region = 103 }
 0x250   : > { %s2090_s0 = smov %s2082_s10 }
 0x255   :  { %874 = vsyncpa [#allocation5], 1 }
 0x256   :  { %876 = vsyncpa [#allocation5 + $0x1], 1 }
 0x257   :  { %877 = vsyncpa [#allocation7], 1 }
 0x258   :  { %879 = vsyncpa [#allocation7 + $0x1], 1 }

</bundles_post_ra>
